<compile_context>
chip_gen: v5e
topology: v5e:2x2
jax: 0.10.0
libtpu: 0.0.40
codegen_flags: <defaults>
</compile_context>

<pallas_src>
import jax
import jax.numpy as jnp
from jax.experimental import pallas as pl
from jax.experimental.pallas import tpu as pltpu


LANES = 128
TWO_PI_APPROX = 2.0 * 3.14  # matches the PyTorch source: 2 * 3.14 (NOT 2*pi)


# ---------------------------------------------------------------------------
# Fast path: input_dim == 1, batch-invariant, lane-dense (rows, 128) output.
#   row r, lane l  <->  t = r*rep + l//E, e = l%E   (rep = 128/E)
#   out2d[r, l] = r * a[l] + c[l]
#     a[l] = rep * freq[l%E]
#     c[l] = (l//E) * freq[l%E] + 2*3.14*sigmoid(phase[l%E])
# ---------------------------------------------------------------------------
def _fast_kernel(a_ref, c_ref, out_ref):
    tile_rows, lanes = out_ref.shape
    r0 = pl.program_id(0) * tile_rows
    row = (jax.lax.broadcasted_iota(jnp.int32, (tile_rows, lanes), 0) + r0
           ).astype(jnp.float32)
    out_ref[...] = row * a_ref[...] + c_ref[...]


def _fast_row_tile(rows, target=8192):
    """Row tile for the lane-dense fast path.

    Targets 2-4 MiB f32 output blocks and always yields >=2 grid steps when
    there is meaningful work so the row axis can shard across v7x's two
    TensorCores.  Tiles are multiples of 8 rows; pl.cdiv masks the tail.
    """
    if rows > target:
        return target
    if rows >= 16:
        half = (rows + 1) // 2
        return ((half + 7) // 8) * 8
    return rows


def _position_embedding_fast(B, T, E, freq_weight, phase_weight):
    rep = LANES // E
    rows = (T * E) // LANES
    tile_rows = _fast_row_tile(rows)

    # Tiny (E,)-sized precompute in the wrapper (sigmoid runs E times total).
    freq_row = freq_weight[0].astype(jnp.float32)                       # (E,)
    phase_row = TWO_PI_APPROX * jax.nn.sigmoid(
        phase_weight[0].astype(jnp.float32))                            # (E,)
    freq_lane = jnp.tile(freq_row, rep)                                 # (128,)
    phase_lane = jnp.tile(phase_row, rep)                               # (128,)
    lane_t = (jnp.arange(LANES) // E).astype(jnp.float32)               # (128,)
    a_lane = (float(rep) * freq_lane).reshape(1, LANES)
    c_lane = (lane_t * freq_lane + phase_lane).reshape(1, LANES)

    out2d = pl.pallas_call(
        _fast_kernel,
        out_shape=jax.ShapeDtypeStruct((rows, LANES), jnp.float32),
        grid_spec=pltpu.PrefetchScalarGridSpec(
            num_scalar_prefetch=0,
            grid=(pl.cdiv(rows, tile_rows),),
            in_specs=[
                pl.BlockSpec((1, LANES), lambda r: (0, 0)),
                pl.BlockSpec((1, LANES), lambda r: (0, 0)),
            ],
            out_specs=pl.BlockSpec((tile_rows, LANES), lambda r: (r, 0)),
        ),
        compiler_params=pltpu.CompilerParams(
            dimension_semantics=("parallel",),
            vmem_limit_bytes=48 * 1024 * 1024,
        ),
    )(a_lane, c_lane)
    # Batch-invariant: broadcast (fuses into downstream consumers under jit).
    return jnp.broadcast_to(out2d.reshape(1, T, E), (B, T, E))


# ---------------------------------------------------------------------------
# General lane-dense path (any input_dim, E | 128, 128 | T*E):
#   indices enter as (B, rows, rep) blocks, the (input_dim, E) table lookup is
#   one f32 one-hot matmul on the MXU against a stacked (input_dim*rep, 256)
#   [freq | phase] table, output is stored lane-dense (full 128-lane vst).
# ---------------------------------------------------------------------------
def _general_lane_dense_kernel(idx_ref, w_ref, out_ref):
    _, tile_rows, lanes = out_ref.shape
    rep = idx_ref.shape[2]
    K = w_ref.shape[0]
    E = lanes // rep

    idx = idx_ref[0].astype(jnp.int32)                        # (tile_rows, rep)

    # One-hot O[r, d*rep + j] = (idx[r, j] == d), built with broadcasts +
    # compares only (no in-VMEM reshape/concat), then one MXU matmul.
    col = jax.lax.broadcasted_iota(jnp.int32, (tile_rows, K), 1)
    d_of = col // rep
    j_of = col % rep
    idx_b = jnp.zeros((tile_rows, K), jnp.int32)
    for j in range(rep):                                      # static, rep = 128//E
        idx_b = idx_b + jnp.where(j_of == j, idx[:, j:j + 1], 0)
    onehot = (idx_b == d_of).astype(jnp.float32)              # (tile_rows, K)

    fp = jnp.dot(onehot, w_ref[...],
                 preferred_element_type=jnp.float32)          # (tile_rows, 2*lanes)
    freq = fp[:, :lanes]
    phase = fp[:, lanes:]

    r0 = pl.program_id(1) * tile_rows
    row = jax.lax.broadcasted_iota(jnp.int32, (tile_rows, lanes), 0) + r0
    lane = jax.lax.broadcasted_iota(jnp.int32, (tile_rows, lanes), 1)
    t = (row * rep + lane // E).astype(jnp.float32)
    out_ref[...] = (t * freq + phase)[None, :, :]


def _position_embedding_general_lane_dense(x, freq_weight, phase_weight,
                                           input_dim):
    B, T = x.shape
    E = freq_weight.shape[1]
    rep = LANES // E
    rows = T // rep
    K = input_dim * rep

    # Stacked selection table W (K, 256), row k = d*rep + j:
    #   W[k, l]       = freq[d, l%E]       if l//E == j else 0   (l < 128)
    #   W[k, 128 + l] = phase_sig[d, l%E]  if l//E == j else 0   (l < 128)
    # so (one_hot @ W)[r, :128] = freq[x[b, r*rep + l//E], l%E], etc.
    freq_tab = freq_weight.astype(jnp.float32)                       # (D, E)
    phase_tab = TWO_PI_APPROX * jax.nn.sigmoid(
        phase_weight.astype(jnp.float32))                            # (D, E)
    lane = jnp.arange(LANES)
    e_of_lane = lane % E
    j_of_lane = lane // E
    mask = (jnp.arange(rep)[:, None] == j_of_lane[None, :]
            ).astype(jnp.float32)                                    # (rep, 128)
    w_freq = freq_tab[:, e_of_lane][:, None, :] * mask[None]         # (D, rep, 128)
    w_phase = phase_tab[:, e_of_lane][:, None, :] * mask[None]       # (D, rep, 128)
    w = jnp.concatenate([w_freq, w_phase], axis=-1).reshape(K, 2 * LANES)

    idx = x.astype(jnp.int32).reshape(B, rows, rep)   # cheap reshape, same bytes

    tile_rows = rows if rows <= 4096 else 4096        # <= 2 MiB output block

    out = pl.pallas_call(
        _general_lane_dense_kernel,
        out_shape=jax.ShapeDtypeStruct((B, rows, LANES), jnp.float32),
        grid_spec=pltpu.PrefetchScalarGridSpec(
            num_scalar_prefetch=0,
            grid=(B, pl.cdiv(rows, tile_rows)),
            in_specs=[
                pl.BlockSpec((1, tile_rows, rep), lambda b, r: (b, r, 0)),
                pl.BlockSpec((K, 2 * LANES), lambda b, r: (0, 0)),
            ],
            out_specs=pl.BlockSpec((1, tile_rows, LANES),
                                   lambda b, r: (b, r, 0)),
        ),
        compiler_params=pltpu.CompilerParams(
            dimension_semantics=("parallel", "parallel"),
            vmem_limit_bytes=48 * 1024 * 1024,
        ),
    )(idx, w)
    return out.reshape(B, T, E)


# ---------------------------------------------------------------------------
# Fallback path (E does not divide 128): small-tile select-unroll. Indices
# outside [0, input_dim) produce 0 (all selects miss), like the old version.
# ---------------------------------------------------------------------------
def _fallback_kernel(idx_ref, freq_tab_ref, phase_tab_ref, out_ref):
    _, tile_t, E = out_ref.shape
    input_dim = freq_tab_ref.shape[0]

    idx = idx_ref[0]                                          # (tile_t, 1) int32
    freq = jnp.zeros((tile_t, E), jnp.float32)
    phase = jnp.zeros((tile_t, E), jnp.float32)
    # TODO(synk): for large input_dim on this (rare) path, switch to a one-hot
    # MXU matmul like the lane-dense path instead of the VALU unroll.
    for d in range(input_dim):                                # static unroll
        sel = (idx == d).astype(jnp.float32)                  # (tile_t, 1)
        freq = freq + sel * freq_tab_ref[pl.ds(d, 1), :]
        phase = phase + sel * phase_tab_ref[pl.ds(d, 1), :]

    t0 = pl.program_id(1) * tile_t
    pos = (jax.lax.broadcasted_iota(jnp.int32, (tile_t, E), 0) + t0
           ).astype(jnp.float32)
    out_ref[...] = (pos * freq + phase)[None, :, :]


def _position_embedding_fallback(x, freq_weight, phase_weight, input_dim):
    B, T = x.shape
    E = freq_weight.shape[1]

    idx3 = x.astype(jnp.int32).reshape(B, T, 1)
    freq_tab = freq_weight.astype(jnp.float32)
    phase_tab = TWO_PI_APPROX * jax.nn.sigmoid(
        phase_weight.astype(jnp.float32))

    tile_t = T if T <= 256 else 256   # keeps the padded (tile_t, 1) idx block tiny

    return pl.pallas_call(
        _fallback_kernel,
        out_shape=jax.ShapeDtypeStruct((B, T, E), jnp.float32),
        grid_spec=pltpu.PrefetchScalarGridSpec(
            num_scalar_prefetch=0,
            grid=(B, pl.cdiv(T, tile_t)),
            in_specs=[
                pl.BlockSpec((1, tile_t, 1), lambda b, t: (b, t, 0)),
                pl.BlockSpec(freq_tab.shape, lambda b, t: (0, 0)),
                pl.BlockSpec(phase_tab.shape, lambda b, t: (0, 0)),
            ],
            out_specs=pl.BlockSpec((1, tile_t, E), lambda b, t: (b, t, 0)),
        ),
        compiler_params=pltpu.CompilerParams(
            dimension_semantics=("parallel", "parallel"),
            vmem_limit_bytes=32 * 1024 * 1024,
        ),
    )(idx3, freq_tab, phase_tab)


# ---------------------------------------------------------------------------
# Public entry point
# ---------------------------------------------------------------------------
def position_embedding(x, freq_weight, phase_weight, *, input_dim=1,
                       zero_phase=False):
    """x: (B, T) integer indices into the (input_dim, E) embedding tables."""
    B, T = x.shape
    E = freq_weight.shape[1]

    if zero_phase:
        # The reference module zeroes the ENTIRE output; skip all work.
        return jnp.zeros((B, T, E), jnp.float32)

    lane_dense_ok = (E <= LANES) and (LANES % E == 0) and ((T * E) % LANES == 0)

    if input_dim == 1:
        if lane_dense_ok:
            # Indices are irrelevant (module zeroes x); batch-invariant path.
            return _position_embedding_fast(B, T, E, freq_weight, phase_weight)
        x = jnp.zeros_like(x)   # matches torch.zeros_like(x) in forward

    if lane_dense_ok:
        return _position_embedding_general_lane_dense(
            x, freq_weight, phase_weight, input_dim)
    return _position_embedding_fallback(x, freq_weight, phase_weight, input_dim)


# ---------------------------------------------------------------------------
# Parameters + pure-JAX reference (for verification)
# ---------------------------------------------------------------------------
def make_params(embed_dim, input_dim, key):
    # frequency_inits = 1 / 10000 ** (arange(E) / E), tiled to (input_dim, E)
    frequency_inits = 1.0 / jnp.power(
        10000.0, jnp.arange(embed_dim, dtype=jnp.float32) / embed_dim)
    frequency_matrix = jnp.tile(frequency_inits[None, :], (input_dim, 1))
    # phase_matrix = torch.rand(input_dim, embed_dim) -> uniform [0, 1)
    phase_matrix = jax.random.uniform(key, (input_dim, embed_dim),
                                      dtype=jnp.float32)
    return frequency_matrix, phase_matrix


def _reference(x, freq_w, phase_w, input_dim, zero_phase):
    B, T = x.shape
    if input_dim == 1:
        x = jnp.zeros_like(x)
    phases = TWO_PI_APPROX * jax.nn.sigmoid(phase_w[x])
    positions = jnp.arange(T, dtype=jnp.float32)[None, :, None]
    out = positions * freq_w[x] + phases
    if zero_phase:
        out = jnp.zeros_like(out)
    return out


if __name__ == "__main__":
    B, T, E = 2, 8, 32

    key = jax.random.PRNGKey(0)
    k_phase1, k_phase3, k_phase_f, k_x = jax.random.split(key, 4)

    # --- default module config: input_dim=1 (batch-invariant fast path) -----
    freq_w1, phase_w1 = make_params(E, 1, k_phase1)
    x = jax.random.randint(k_x, (B, T), 0, 1, dtype=jnp.int32)
    out1 = jax.block_until_ready(
        position_embedding(x, freq_w1, phase_w1, input_dim=1, zero_phase=False))
    ref1 = _reference(x, freq_w1, phase_w1, 1, False)
    assert out1.shape == (B, T, E) and out1.dtype == jnp.float32
    assert jnp.allclose(out1, ref1, atol=1e-5, rtol=1e-5)

    # --- input_dim > 1: lane-dense one-hot-matmul gather path ---------------
    input_dim = 3
    freq_w3, phase_w3 = make_params(E, input_dim, k_phase3)
    x3 = jax.random.randint(k_x, (B, T), 0, input_dim, dtype=jnp.int32)
    out3 = jax.block_until_ready(
        position_embedding(x3, freq_w3, phase_w3, input_dim=input_dim,
                           zero_phase=False))
    ref3 = _reference(x3, freq_w3, phase_w3, input_dim, False)
    assert out3.shape == (B, T, E) and out3.dtype == jnp.float32
    assert jnp.allclose(out3, ref3, atol=1e-5, rtol=1e-5)

    # --- E that does not divide 128: select-unroll fallback path ------------
    E_f = 24
    freq_wf, phase_wf = make_params(E_f, input_dim, k_phase_f)
    outf = jax.block_until_ready(
        position_embedding(x3, freq_wf, phase_wf, input_dim=input_dim,
                           zero_phase=False))
    reff = _reference(x3, freq_wf, phase_wf, input_dim, False)
    assert outf.shape == (B, T, E_f) and outf.dtype == jnp.float32
    assert jnp.allclose(outf, reff, atol=1e-5, rtol=1e-5)

    # --- zero_phase short-circuit --------------------------------------------
    out0 = jax.block_until_ready(
        position_embedding(x, freq_w1, phase_w1, input_dim=1, zero_phase=True))
    assert jnp.array_equal(out0, jnp.zeros((B, T, E), jnp.float32))

    print("KERNEL_OK")
</pallas_src>

<mosaic_0001>
module attributes {stable_mosaic.version = 11 : i64} {
  func.func @_fast_kernel(%arg0: i32, %arg1: memref<1x128xf32, #tpu.memory_space<vmem>>, %arg2: memref<1x128xf32, #tpu.memory_space<vmem>>, %arg3: memref<2x128xf32, #tpu.memory_space<vmem>>) attributes {dimension_semantics = [#tpu.dimension_semantics<parallel>], iteration_bounds = array<i64: 1>, scalar_prefetch = 0 : i64, scratch_operands = 0 : i64, tpu.core_type = #tpu.core_type<tc>, window_params = [{pipeline_mode = #tpu.pipeline_mode<synchronous>, transform_indices = @transform_0, window_bounds = array<i64: 1, 128>}, {pipeline_mode = #tpu.pipeline_mode<synchronous>, transform_indices = @transform_1, window_bounds = array<i64: 1, 128>}, {transform_indices = @transform_2, window_bounds = array<i64: 2, 128>}]} {
    %c2_i32 = arith.constant 2 : i32
    %0 = arith.muli %arg0, %c2_i32 : i32
    %1 = tpu.iota {dimensions = array<i32: 0>} : vector<2x128xi32>
    %2 = vector.broadcast %0 : i32 to vector<2x128xi32>
    %3 = arith.addi %1, %2 : vector<2x128xi32>
    %4 = arith.sitofp %3 : vector<2x128xi32> to vector<2x128xf32>
    %c0 = arith.constant 0 : index
    %c0_0 = arith.constant 0 : index
    %5 = vector.load %arg1[%c0, %c0_0] : memref<1x128xf32, #tpu.memory_space<vmem>>, vector<1x128xf32>
    %6 = vector.broadcast %5 : vector<1x128xf32> to vector<2x128xf32>
    %7 = arith.mulf %4, %6 : vector<2x128xf32>
    %c0_1 = arith.constant 0 : index
    %c0_2 = arith.constant 0 : index
    %8 = vector.load %arg2[%c0_1, %c0_2] : memref<1x128xf32, #tpu.memory_space<vmem>>, vector<1x128xf32>
    %9 = vector.broadcast %8 : vector<1x128xf32> to vector<2x128xf32>
    %10 = arith.addf %7, %9 : vector<2x128xf32>
    %c0_3 = arith.constant 0 : index
    %c0_4 = arith.constant 0 : index
    %11 = vector.load %arg3[%c0_3, %c0_4] : memref<2x128xf32, #tpu.memory_space<vmem>>, vector<2x128xf32>
    tpu.vector_store %arg3[%c0_3, %c0_4], %10 {strides = array<i32>} : memref<2x128xf32, #tpu.memory_space<vmem>>, vector<2x128xf32>,
    return
  }
  func.func @transform_0(%arg0: i32) -> (i32, i32) {
    %c0_i32 = arith.constant 0 : i32
    %c0_i32_0 = arith.constant 0 : i32
    %c0_i32_1 = arith.constant 0 : i32
    return %c0_i32, %c0_i32_0 : i32, i32
  }
  func.func @transform_1(%arg0: i32) -> (i32, i32) {
    %c0_i32 = arith.constant 0 : i32
    %c0_i32_0 = arith.constant 0 : i32
    %c0_i32_1 = arith.constant 0 : i32
    return %c0_i32, %c0_i32_0 : i32, i32
  }
  func.func @transform_2(%arg0: i32) -> (i32, i32) {
    %c0_i32 = arith.constant 0 : i32
    %c0_i32_0 = arith.constant 0 : i32
    return %arg0, %c0_i32 : i32, i32
  }
}

</mosaic_0001>

<bundles_post_ra>
// kernel: tpu_custom_call.1
= control target key start
LH: loop header
LB: loop body
LE: loop exit
PB: predicated region body
PF: predicated region fallthrough
CT: control target
= control target key end

     0   :  { %7 = vsyncpa [#allocation3], 0  ;;  %s185_s0 = inlined_call_operand.hbm [shape: f32[1,128], index: 0, kind: input, shape index: {}]   ;;  %s186_s1 = inlined_call_operand.hbm [shape: f32[1,128], index: 1, kind: input, shape index: {}]   ;;  %s187_s2 = inlined_call_operand.hbm [shape: f32[2,128], index: 2, kind: output, shape index: {}]  }
   0x1   :  { %8 = vsyncpa [#allocation6], 0 }
   0x2   :  { %9 = vsyncpa [#allocation4], 0  ;;  %s15_s11 = sshll.u32 %s185_s0, 4  ;;  %s158_s12 = smov [#allocation2]   ;;  %s16_s11 = int_to_ptr.hbm [resolvable:$true] %s15_s11 }
   0x3   :  { %s17_s13 = sshll.u32 %s158_s12, 4  ;;  %s26_s16 = sshll.u32 %s186_s1, 4  ;;  %s18_s13 = int_to_ptr.vmem [resolvable:$true] %s17_s13  ;;  %s27_s16 = int_to_ptr.hbm [resolvable:$true] %s26_s16 }
   0x4   :  { %20 = dma.hbm_to_vmem [thread:$0]  %s16_s11, 16, %s18_s13, [#allocation3]  }
   0x5   :  { %s159_s17 = smov [#allocation5]  }
   0x6   :  { %s28_s18 = sshll.u32 %s159_s17, 4  ;;  %s29_s18 = int_to_ptr.vmem [resolvable:$true] %s28_s18 }
   0x7   :  { %31 = dma.hbm_to_vmem [thread:$0]  %s27_s16, 16, %s29_s18, [#allocation6]  }
   0x8   :  { %152 = dma.done.wait [#allocation3], 16  }
   0x9   :  { %153 = vsyncadd [#allocation3], 4294967280 }
   0xa   :  { %154 = dma.done.wait [#allocation6], 16  }
   0xb   :  { %155 = vsyncadd [#allocation6], 4294967280  ;;  %v41_v0 = vlaneseq  ;;  %v78_v3 = vld [vmem:[#allocation2] ss:$0 sm:$0xff]  ;;  %v79_v4 = vld [vmem:[#allocation5] ss:$0 sm:$0xff] }
   0xc   :  { %s160_s0 = smov [#allocation7]   ;;  %s64_s1 = sshll.u32 %s187_s2, 4  ;;  %s65_s1 = int_to_ptr.hbm [resolvable:$true] %s64_s1 }
   0xd   :  { %v42_v1 = vshrl.u32 %v41_v0, 7  ;;  %s62_s19 = sshll.u32 %s160_s0, 4  ;;  %s63_s19 = int_to_ptr.vmem [resolvable:$true] %s62_s19 }
   0xf   :  { %v45_v2 = vcvt.s32.f32 %v42_v1 }
  0x11   :  { %v50_v5 = vmul.f32 %v78_v3, %v45_v2 }
  0x13   :  { %v55_v6 = vadd.f32 %v79_v4, %v50_v5 }
  0x15   :  { %56 = vst [vmem:[#allocation7] sm:$0x3] %v55_v6 }
  0x16   :  { %67 = dma.vmem_to_hbm [thread:$0]  %s63_s19, 32, %s65_s1, [#allocation4]  }
  0x17   :  { %156 = dma.done.wait [#allocation4], 32  }
  0x18   :  { %157 = vsyncadd [#allocation4], 4294967264 }
  0x19   :  { %72 = vsyncpa [#allocation3], 1 }
  0x1a   :  { %73 = vsyncpa [#allocation6], 1 }
  0x1b   :  { %74 = vsyncpa [#allocation4], 1 }

</bundles_post_ra>
